<compile_context>
chip_gen: v7x
topology: tpu7x:2x2x1
jax: 0.10.0
libtpu: 0.0.40
codegen_flags: <defaults>
</compile_context>

<pallas_src>
import functools

import jax
import jax.numpy as jnp
from jax.experimental import pallas as pl
from jax.experimental.pallas import tpu as pltpu

_LANE = 128     # vreg lane width  (last dim)
_SUBLANE = 8    # vreg sublane width (second-to-last dim)


def _round_up(n, m):
    return ((n + m - 1) // m) * m


def _fused_dist_sage_kernel(*refs, n_layers, nd_pads):
    """Fully fused DistSAGE forward.

    refs layout (inputs..., output):
      refs[0]                 : x        [ns0_pad, f0_pad]   padded input features
      refs[1 + 3*i + 0]       : a_i      [nd_i_pad, ns_i_pad]  row-normalized adjacency
      refs[1 + 3*i + 1]       : wcat_i   [2*fin_i_pad, fout_i_pad]  [W_self^T ; W_neigh^T]
      refs[1 + 3*i + 2]       : b_i      [1, fout_i_pad]
      refs[1 + 3*n_layers]    : out      [nd_last_pad, fout_last_pad]

    All intermediates stay in VMEM; padded rows/cols are zero-filled on the
    host so they never pollute the real output rows.
    """
    x_ref = refs[0]
    o_ref = refs[1 + 3 * n_layers]

    h = x_ref[...]  # [ns0_pad, F_pad], resident in VMEM/vregs for all layers
    for i in range(n_layers):
        a_ref = refs[1 + 3 * i]
        w_ref = refs[2 + 3 * i]
        b_ref = refs[3 + 3 * i]
        nd = nd_pads[i]

        # Mean aggregation: one MXU matmul with the row-normalized adjacency.
        # TODO(synk): for production fanouts replace the dense adjacency with a
        # scalar-prefetched index gather (PrefetchScalarGridSpec) and tile the
        # node axis (grid over Nd, reduction over Ns last) -- dense A is only
        # viable at these sampled-toy sizes.
        neigh = jnp.dot(a_ref[...], h, preferred_element_type=jnp.float32)

        # DGL block convention: dst nodes are the first rows of the src nodes.
        h_dst = h[:nd, :]  # static sublane-aligned slice, no DMA

        # Single fused output matmul: [h_dst | neigh] @ [W_self^T ; W_neigh^T]
        # TODO(synk): on v6e/v7x cast cat/w to bf16 (keep f32 accumulation) for
        # 2x MXU throughput at production sizes (needs relaxed tolerances).
        cat = jnp.concatenate([h_dst, neigh], axis=-1)
        h = jnp.dot(cat, w_ref[...], preferred_element_type=jnp.float32) + b_ref[...]

        if i != n_layers - 1:
            # activation (ReLU); dropout is identity (eval/inference semantics).
            # TODO(synk): training-mode stochastic dropout not reproduced.
            h = jnp.maximum(h, 0.0)

    o_ref[...] = h.astype(o_ref.dtype)


def dist_sage_forward(blocks_adj, x, params):
    """DistSAGE.forward: h = x; for each (layer, block): h = SAGEConv(block, h);
    ReLU (+ identity dropout) on all but the last layer.  One fused kernel call."""
    n_layers = len(params)
    assert len(blocks_adj) == n_layers

    # ---- host-side padding to TPU-friendly (sublane, lane) shapes ----------
    node_counts = [blocks_adj[0].shape[1]] + [a.shape[0] for a in blocks_adj]
    ns_pads = [_round_up(n, _SUBLANE) for n in node_counts]
    fins = [w.shape[0] for (w, _, _) in params]
    fouts = [w.shape[1] for (w, _, _) in params]
    fin_pads = [_round_up(f, _LANE) for f in fins]
    fout_pads = [_round_up(f, _LANE) for f in fouts]
    for i in range(n_layers - 1):
        assert fout_pads[i] == fin_pads[i + 1], "padded feature dims must chain"

    # padded, lane-dense input features
    x_pad = (
        jnp.zeros((ns_pads[0], fin_pads[0]), jnp.float32)
        .at[: x.shape[0], : x.shape[1]]
        .set(x)
    )

    layer_inputs = []
    in_specs = [pl.BlockSpec((ns_pads[0], fin_pads[0]), lambda i: (0, 0))]
    for li in range(n_layers):
        adj = blocks_adj[li]
        nd, ns = adj.shape
        nd_p, ns_p = ns_pads[li + 1], ns_pads[li]
        a_pad = jnp.zeros((nd_p, ns_p), jnp.float32).at[:nd, :ns].set(adj)

        w_self_t, w_neigh_t, bias = params[li]
        fi, fo = fins[li], fouts[li]
        fi_p, fo_p = fin_pads[li], fout_pads[li]
        # Concatenate + zero-pad weights once on the host: [W_self^T ; W_neigh^T]
        w_cat = jnp.zeros((2 * fi_p, fo_p), jnp.float32)
        w_cat = w_cat.at[:fi, :fo].set(w_self_t)
        w_cat = w_cat.at[fi_p : fi_p + fi, :fo].set(w_neigh_t)
        b_pad = jnp.zeros((1, fo_p), jnp.float32).at[:, :fo].set(bias.reshape(1, -1))

        layer_inputs += [a_pad, w_cat, b_pad]
        in_specs += [
            pl.BlockSpec((nd_p, ns_p), lambda i: (0, 0)),
            pl.BlockSpec((2 * fi_p, fo_p), lambda i: (0, 0)),
            pl.BlockSpec((1, fo_p), lambda i: (0, 0)),
        ]

    nd_last_p = ns_pads[-1]
    fo_last_p = fout_pads[-1]

    kernel = functools.partial(
        _fused_dist_sage_kernel,
        n_layers=n_layers,
        nd_pads=tuple(ns_pads[1:]),
    )
    out_pad = pl.pallas_call(
        kernel,
        out_shape=jax.ShapeDtypeStruct((nd_last_p, fo_last_p), jnp.float32),
        grid=(1,),
        in_specs=in_specs,
        out_specs=pl.BlockSpec((nd_last_p, fo_last_p), lambda i: (0, 0)),
        compiler_params=pltpu.CompilerParams(
            dimension_semantics=("arbitrary",),
            vmem_limit_bytes=32 * 1024 * 1024,
        ),
    )(x_pad, *layer_inputs)

    # strip padding: real dst nodes x real classes
    return out_pad[: node_counts[-1], : fouts[-1]]


def dist_sage_reference(blocks_adj, x, params):
    """Pure-JAX reference for correctness check (unpadded)."""
    h = x
    n_layers = len(params)
    for i, (adj_norm, (w_self_t, w_neigh_t, bias)) in enumerate(zip(blocks_adj, params)):
        nd = adj_norm.shape[0]
        h_dst = h[:nd]
        neigh = adj_norm @ h
        h = h_dst @ w_self_t + neigh @ w_neigh_t + bias
        if i != n_layers - 1:
            h = jnp.maximum(h, 0.0)
    return h


if __name__ == "__main__":
    key = jax.random.PRNGKey(0)

    # Model config (small): 3 SAGEConv layers: in->hidden, hidden->hidden, hidden->classes
    in_feats, n_hidden, n_classes, n_layers = 32, 32, 8, 3
    # Node counts per "hop" (fan-in sampled blocks): 64 src -> 32 -> 16 -> 8 dst
    node_counts = [64, 32, 16, 8]

    dims = [in_feats] + [n_hidden] * (n_layers - 1) + [n_classes]

    # Deterministic parameter init (W_self, W_neigh, bias per layer), stored pre-transposed.
    params = []
    for li in range(n_layers):
        fin, fout = dims[li], dims[li + 1]
        key, k1, k2, k3 = jax.random.split(key, 4)
        w_self_t = jax.random.normal(k1, (fin, fout), jnp.float32) * 0.1
        w_neigh_t = jax.random.normal(k2, (fin, fout), jnp.float32) * 0.1
        bias = jax.random.normal(k3, (1, fout), jnp.float32) * 0.01
        params.append((w_self_t, w_neigh_t, bias))

    # Deterministic block adjacencies (dense, row-normalized -> mean aggregation).
    blocks_adj = []
    for li in range(n_layers):
        nd, ns = node_counts[li + 1], node_counts[li]
        key, ka = jax.random.split(key)
        adj = jax.random.bernoulli(ka, 0.3, (nd, ns)).astype(jnp.float32)
        deg = jnp.maximum(adj.sum(axis=1, keepdims=True), 1.0)
        blocks_adj.append(adj / deg)

    # Input node features.
    key, kx = jax.random.split(key)
    x = jax.random.normal(kx, (node_counts[0], in_feats), jnp.float32)

    out = dist_sage_forward(blocks_adj, x, params)
    out = jax.block_until_ready(out)

    ref = dist_sage_reference(blocks_adj, x, params)
    assert out.shape == (node_counts[-1], n_classes)
    assert jnp.allclose(out, ref, atol=2e-5, rtol=1e-4), float(jnp.max(jnp.abs(out - ref)))

    print("KERNEL_OK")
</pallas_src>

<mosaic_0001>
module attributes {stable_mosaic.version = 11 : i64} {
  func.func @_fused_dist_sage_kernel(%arg0: i32, %arg1: memref<64x128xf32, #tpu.memory_space<vmem>>, %arg2: memref<32x64xf32, #tpu.memory_space<vmem>>, %arg3: memref<256x128xf32, #tpu.memory_space<vmem>>, %arg4: memref<1x128xf32, #tpu.memory_space<vmem>>, %arg5: memref<16x32xf32, #tpu.memory_space<vmem>>, %arg6: memref<256x128xf32, #tpu.memory_space<vmem>>, %arg7: memref<1x128xf32, #tpu.memory_space<vmem>>, %arg8: memref<8x16xf32, #tpu.memory_space<vmem>>, %arg9: memref<256x128xf32, #tpu.memory_space<vmem>>, %arg10: memref<1x128xf32, #tpu.memory_space<vmem>>, %arg11: memref<8x128xf32, #tpu.memory_space<vmem>>) attributes {dimension_semantics = [#tpu.dimension_semantics<arbitrary>], iteration_bounds = array<i64: 1>, scalar_prefetch = 0 : i64, scratch_operands = 0 : i64, tpu.core_type = #tpu.core_type<tc>, window_params = [{pipeline_mode = #tpu.pipeline_mode<synchronous>, transform_indices = @transform_0, window_bounds = array<i64: 64, 128>}, {pipeline_mode = #tpu.pipeline_mode<synchronous>, transform_indices = @transform_1, window_bounds = array<i64: 32, 64>}, {pipeline_mode = #tpu.pipeline_mode<synchronous>, transform_indices = @transform_2, window_bounds = array<i64: 256, 128>}, {pipeline_mode = #tpu.pipeline_mode<synchronous>, transform_indices = @transform_3, window_bounds = array<i64: 1, 128>}, {pipeline_mode = #tpu.pipeline_mode<synchronous>, transform_indices = @transform_4, window_bounds = array<i64: 16, 32>}, {pipeline_mode = #tpu.pipeline_mode<synchronous>, transform_indices = @transform_5, window_bounds = array<i64: 256, 128>}, {pipeline_mode = #tpu.pipeline_mode<synchronous>, transform_indices = @transform_6, window_bounds = array<i64: 1, 128>}, {pipeline_mode = #tpu.pipeline_mode<synchronous>, transform_indices = @transform_7, window_bounds = array<i64: 8, 16>}, {pipeline_mode = #tpu.pipeline_mode<synchronous>, transform_indices = @transform_8, window_bounds = array<i64: 256, 128>}, {pipeline_mode = #tpu.pipeline_mode<synchronous>, transform_indices = @transform_9, window_bounds = array<i64: 1, 128>}, {pipeline_mode = #tpu.pipeline_mode<synchronous>, transform_indices = @transform_10, window_bounds = array<i64: 8, 128>}]} {
    %c0 = arith.constant 0 : index
    %c0_0 = arith.constant 0 : index
    %0 = vector.load %arg1[%c0, %c0_0] : memref<64x128xf32, #tpu.memory_space<vmem>>, vector<64x128xf32>
    %c0_1 = arith.constant 0 : index
    %c0_2 = arith.constant 0 : index
    %1 = vector.load %arg2[%c0_1, %c0_2] : memref<32x64xf32, #tpu.memory_space<vmem>>, vector<32x64xf32>
    %cst = arith.constant dense<0.000000e+00> : vector<32x128xf32>
    %2 = tpu.matmul %1, %0, %cst {dimension_numbers = #tpu.dot_dimension_numbers<[1], [0], [0], [1], [0, 0, 1, 1], [], []>} : vector<32x64xf32>, vector<64x128xf32>, vector<32x128xf32> -> vector<32x128xf32>
    %3 = vector.extract_strided_slice %0 {offsets = [0, 0], sizes = [32, 128], strides = [1, 1]} : vector<64x128xf32> to vector<32x128xf32>
    %4 = tpu.concatenate %3, %2 in 1 : vector<32x128xf32>, vector<32x128xf32> -> vector<32x256xf32>
    %c0_3 = arith.constant 0 : index
    %c0_4 = arith.constant 0 : index
    %5 = vector.load %arg3[%c0_3, %c0_4] : memref<256x128xf32, #tpu.memory_space<vmem>>, vector<256x128xf32>
    %cst_5 = arith.constant dense<0.000000e+00> : vector<32x128xf32>
    %6 = tpu.matmul %4, %5, %cst_5 {dimension_numbers = #tpu.dot_dimension_numbers<[1], [0], [0], [1], [0, 0, 1, 1], [], []>} : vector<32x256xf32>, vector<256x128xf32>, vector<32x128xf32> -> vector<32x128xf32>
    %c0_6 = arith.constant 0 : index
    %c0_7 = arith.constant 0 : index
    %7 = vector.load %arg4[%c0_6, %c0_7] : memref<1x128xf32, #tpu.memory_space<vmem>>, vector<1x128xf32>
    %8 = vector.broadcast %7 : vector<1x128xf32> to vector<32x128xf32>
    %9 = arith.addf %6, %8 : vector<32x128xf32>
    %cst_8 = arith.constant 0.000000e+00 : f32
    %10 = vector.broadcast %cst_8 : f32 to vector<32x128xf32>
    %11 = arith.maximumf %9, %10 : vector<32x128xf32>
    %c0_9 = arith.constant 0 : index
    %c0_10 = arith.constant 0 : index
    %12 = vector.load %arg5[%c0_9, %c0_10] : memref<16x32xf32, #tpu.memory_space<vmem>>, vector<16x32xf32>
    %cst_11 = arith.constant dense<0.000000e+00> : vector<16x128xf32>
    %13 = tpu.matmul %12, %11, %cst_11 {dimension_numbers = #tpu.dot_dimension_numbers<[1], [0], [0], [1], [0, 0, 1, 1], [], []>} : vector<16x32xf32>, vector<32x128xf32>, vector<16x128xf32> -> vector<16x128xf32>
    %14 = vector.extract_strided_slice %11 {offsets = [0, 0], sizes = [16, 128], strides = [1, 1]} : vector<32x128xf32> to vector<16x128xf32>
    %15 = tpu.concatenate %14, %13 in 1 : vector<16x128xf32>, vector<16x128xf32> -> vector<16x256xf32>
    %c0_12 = arith.constant 0 : index
    %c0_13 = arith.constant 0 : index
    %16 = vector.load %arg6[%c0_12, %c0_13] : memref<256x128xf32, #tpu.memory_space<vmem>>, vector<256x128xf32>
    %cst_14 = arith.constant dense<0.000000e+00> : vector<16x128xf32>
    %17 = tpu.matmul %15, %16, %cst_14 {dimension_numbers = #tpu.dot_dimension_numbers<[1], [0], [0], [1], [0, 0, 1, 1], [], []>} : vector<16x256xf32>, vector<256x128xf32>, vector<16x128xf32> -> vector<16x128xf32>
    %c0_15 = arith.constant 0 : index
    %c0_16 = arith.constant 0 : index
    %18 = vector.load %arg7[%c0_15, %c0_16] : memref<1x128xf32, #tpu.memory_space<vmem>>, vector<1x128xf32>
    %19 = vector.broadcast %18 : vector<1x128xf32> to vector<16x128xf32>
    %20 = arith.addf %17, %19 : vector<16x128xf32>
    %cst_17 = arith.constant 0.000000e+00 : f32
    %21 = vector.broadcast %cst_17 : f32 to vector<16x128xf32>
    %22 = arith.maximumf %20, %21 : vector<16x128xf32>
    %c0_18 = arith.constant 0 : index
    %c0_19 = arith.constant 0 : index
    %23 = vector.load %arg8[%c0_18, %c0_19] : memref<8x16xf32, #tpu.memory_space<vmem>>, vector<8x16xf32>
    %cst_20 = arith.constant dense<0.000000e+00> : vector<8x128xf32>
    %24 = tpu.matmul %23, %22, %cst_20 {dimension_numbers = #tpu.dot_dimension_numbers<[1], [0], [0], [1], [0, 0, 1, 1], [], []>} : vector<8x16xf32>, vector<16x128xf32>, vector<8x128xf32> -> vector<8x128xf32>
    %25 = vector.extract_strided_slice %22 {offsets = [0, 0], sizes = [8, 128], strides = [1, 1]} : vector<16x128xf32> to vector<8x128xf32>
    %26 = tpu.concatenate %25, %24 in 1 : vector<8x128xf32>, vector<8x128xf32> -> vector<8x256xf32>
    %c0_21 = arith.constant 0 : index
    %c0_22 = arith.constant 0 : index
    %27 = vector.load %arg9[%c0_21, %c0_22] : memref<256x128xf32, #tpu.memory_space<vmem>>, vector<256x128xf32>
    %cst_23 = arith.constant dense<0.000000e+00> : vector<8x128xf32>
    %28 = tpu.matmul %26, %27, %cst_23 {dimension_numbers = #tpu.dot_dimension_numbers<[1], [0], [0], [1], [0, 0, 1, 1], [], []>} : vector<8x256xf32>, vector<256x128xf32>, vector<8x128xf32> -> vector<8x128xf32>
    %c0_24 = arith.constant 0 : index
    %c0_25 = arith.constant 0 : index
    %29 = vector.load %arg10[%c0_24, %c0_25] : memref<1x128xf32, #tpu.memory_space<vmem>>, vector<1x128xf32>
    %30 = vector.broadcast %29 : vector<1x128xf32> to vector<8x128xf32>
    %31 = arith.addf %28, %30 : vector<8x128xf32>
    %c0_26 = arith.constant 0 : index
    %c0_27 = arith.constant 0 : index
    %32 = vector.load %arg11[%c0_26, %c0_27] : memref<8x128xf32, #tpu.memory_space<vmem>>, vector<8x128xf32>
    tpu.vector_store %arg11[%c0_26, %c0_27], %31 {strides = array<i32>} : memref<8x128xf32, #tpu.memory_space<vmem>>, vector<8x128xf32>,
    return
  }
  func.func @transform_0(%arg0: i32) -> (i32, i32) {
    %c0_i32 = arith.constant 0 : i32
    %c0_i32_0 = arith.constant 0 : i32
    %c0_i32_1 = arith.constant 0 : i32
    return %c0_i32, %c0_i32_0 : i32, i32
  }
  func.func @transform_1(%arg0: i32) -> (i32, i32) {
    %c0_i32 = arith.constant 0 : i32
    %c0_i32_0 = arith.constant 0 : i32
    %c0_i32_1 = arith.constant 0 : i32
    return %c0_i32, %c0_i32_0 : i32, i32
  }
  func.func @transform_2(%arg0: i32) -> (i32, i32) {
    %c0_i32 = arith.constant 0 : i32
    %c0_i32_0 = arith.constant 0 : i32
    %c0_i32_1 = arith.constant 0 : i32
    return %c0_i32, %c0_i32_0 : i32, i32
  }
  func.func @transform_3(%arg0: i32) -> (i32, i32) {
    %c0_i32 = arith.constant 0 : i32
    %c0_i32_0 = arith.constant 0 : i32
    %c0_i32_1 = arith.constant 0 : i32
    return %c0_i32, %c0_i32_0 : i32, i32
  }
  func.func @transform_4(%arg0: i32) -> (i32, i32) {
    %c0_i32 = arith.constant 0 : i32
    %c0_i32_0 = arith.constant 0 : i32
    %c0_i32_1 = arith.constant 0 : i32
    return %c0_i32, %c0_i32_0 : i32, i32
  }
  func.func @transform_5(%arg0: i32) -> (i32, i32) {
    %c0_i32 = arith.constant 0 : i32
    %c0_i32_0 = arith.constant 0 : i32
    %c0_i32_1 = arith.constant 0 : i32
    return %c0_i32, %c0_i32_0 : i32, i32
  }
  func.func @transform_6(%arg0: i32) -> (i32, i32) {
    %c0_i32 = arith.constant 0 : i32
    %c0_i32_0 = arith.constant 0 : i32
    %c0_i32_1 = arith.constant 0 : i32
    return %c0_i32, %c0_i32_0 : i32, i32
  }
  func.func @transform_7(%arg0: i32) -> (i32, i32) {
    %c0_i32 = arith.constant 0 : i32
    %c0_i32_0 = arith.constant 0 : i32
    %c0_i32_1 = arith.constant 0 : i32
    return %c0_i32, %c0_i32_0 : i32, i32
  }
  func.func @transform_8(%arg0: i32) -> (i32, i32) {
    %c0_i32 = arith.constant 0 : i32
    %c0_i32_0 = arith.constant 0 : i32
    %c0_i32_1 = arith.constant 0 : i32
    return %c0_i32, %c0_i32_0 : i32, i32
  }
  func.func @transform_9(%arg0: i32) -> (i32, i32) {
    %c0_i32 = arith.constant 0 : i32
    %c0_i32_0 = arith.constant 0 : i32
    %c0_i32_1 = arith.constant 0 : i32
    return %c0_i32, %c0_i32_0 : i32, i32
  }
  func.func @transform_10(%arg0: i32) -> (i32, i32) {
    %c0_i32 = arith.constant 0 : i32
    %c0_i32_0 = arith.constant 0 : i32
    %c0_i32_1 = arith.constant 0 : i32
    return %c0_i32, %c0_i32_0 : i32, i32
  }
}

</mosaic_0001>

<bundles_post_ra>
// kernel: tpu_custom_call.1
= control target key start
LH: loop header
LB: loop body
LE: loop exit
PB: predicated region body
PF: predicated region fallthrough
CT: control target
= control target key end

     0   :  { %15 = vsyncpa [#allocation3], 0  ;;  %s1484_s0 = inlined_call_operand.hbm [shape: f32[64,128], index: 0, kind: input, shape index: {}]   ;;  %s1485_s1 = inlined_call_operand.hbm [shape: f32[32,64], index: 1, kind: input, shape index: {}]   ;;  %s1486_s2 = inlined_call_operand.hbm [shape: f32[256,128], index: 2, kind: input, shape index: {}]   ;;  %s1487_s3 = inlined_call_operand.vmem [shape: f32[1,128], index: 3, kind: input, shape index: {}]   ;;  %s1488_s4 = inlined_call_operand.hbm [shape: f32[16,32], index: 4, kind: input, shape index: {}]   ;;  %s1489_s5 = inlined_call_operand.hbm [shape: f32[256,128], index: 5, kind: input, shape index: {}]   ;;  %s1490_s6 = inlined_call_operand.vmem [shape: f32[1,128], index: 6, kind: input, shape index: {}]   ;;  %s1491_s7 = inlined_call_operand.vmem [shape: f32[8,16], index: 7, kind: input, shape index: {}]   ;;  %s1492_s8 = inlined_call_operand.hbm [shape: f32[256,128], index: 8, kind: input, shape index: {}]   ;;  %s1493_s9 = inlined_call_operand.vmem [shape: f32[1,128], index: 9, kind: input, shape index: {}]   ;;  %s1494_s10 = inlined_call_operand.hbm [shape: f32[8,128], index: 10, kind: output, shape index: {}]  }
   0x1   :  { %16 = vsyncpa [#allocation6], 0 }
   0x2   :  { %17 = vsyncpa [#allocation9], 0 }
   0x3   :  { %18 = vsyncpa [#allocation12], 0 }
   0x4   :  { %19 = vsyncpa [#allocation4], 0  ;;  %s1246_s13 = smov [#allocation5]   ;;  %s1247_s15 = smov [#allocation8]  }
   0x5   :  { %s37_s14 = sshll.u32 %s1246_s13, 4  ;;  %s63_s16 = sshll.u32 %s1247_s15, 4  ;;  %s38_s14 = int_to_ptr.vmem [resolvable:$true] %s37_s14  ;;  %s1313_s16 = int_to_ptr.vmem [resolvable:$true] %s63_s16 }
   0x6   :  { %s1082_s19 = scalar_lea.hbm %s1485_s1, 512 }
   0x7   :  { %p1083_p0 = scmp.ne.s32.totalorder %s1485_s1, %s1082_s19  ;;  %p1086_p1 = scmp.lt.u32.totalorder %s1082_s19, %s1485_s1 }
   0x9   :  { %p1088_p2 = pnand %p1086_p1, %p1083_p0 }
   0xb   :  { %1091 = shalt.err (!%p1088_p2)
}
   0xc   :  { %s1092_s24 = scalar_lea.vmem %s38_s14, 512  ;;  %p1097_p4 = scmp.lt.s32.totalorder %s38_s14, %s38_s14 }
   0xd   :  { %p1093_p3 = scmp.ne.s32.totalorder %s38_s14, %s1092_s24  ;;  %p1098_p5 = scmp.lt.s32.totalorder %s1092_s24, %s1092_s24 }
   0xf   :  { %p1099_p6 = por %p1098_p5, %p1097_p4 }
  0x11   :  { %p1100_p7 = pnand %p1099_p6, %p1093_p3 }
  0x13   :  { %1103 = shalt.err (!%p1100_p7)
}
  0x14   :  { %s1248_s25 = smov 128   ;;  %s1249_s26 = smov 8  }
  0x15   :  { %43 = dma.hbm_to_vmem [thread:$0]  %s1485_s1, 512, %s38_s14, [#allocation6], %s1248_s25, %s1248_s25, %s1249_s26  }
  0x16   :  { %s1104_s11 = scalar_lea.hbm %s1488_s4, 256 }
  0x17   :  { %p1105_p8 = scmp.ne.s32.totalorder %s1488_s4, %s1104_s11  ;;  %p1108_p9 = scmp.lt.u32.totalorder %s1104_s11, %s1488_s4 }
  0x19   :  { %p1110_p10 = pnand %p1108_p9, %p1105_p8 }
  0x1b   :  { %1113 = shalt.err (!%p1110_p10)
}
  0x1c   :  { %s1114_s18 = scalar_lea.vmem %s1313_s16, 256  ;;  %p1119_p12 = scmp.lt.s32.totalorder %s1313_s16, %s1313_s16 }
  0x1d   :  { %p1115_p11 = scmp.ne.s32.totalorder %s1313_s16, %s1114_s18  ;;  %p1120_p13 = scmp.lt.s32.totalorder %s1114_s18, %s1114_s18 }
  0x1f   :  { %p1121_p0 = por %p1120_p13, %p1119_p12 }
  0x21   :  { %p1122_p1 = pnand %p1121_p0, %p1115_p11 }
  0x23   :  { %1125 = shalt.err (!%p1122_p1)
}
  0x24   :  { %69 = dma.hbm_to_vmem [thread:$0]  %s1488_s4, 256, %s1313_s16, [#allocation9], %s1248_s25, %s1248_s25, %s1249_s26  }
  0x25   :  { %s1250_s19 = smov [#allocation2]   ;;  %s1251_s21 = smov [#allocation7]  }
  0x26   :  { %s25_s20 = sshll.u32 %s1250_s19, 4  ;;  %s49_s22 = sshll.u32 %s1251_s21, 4  ;;  %s26_s20 = int_to_ptr.vmem [resolvable:$true] %s25_s20  ;;  %s1350_s22 = int_to_ptr.vmem [resolvable:$true] %s49_s22 }
  0x27   :  { %s1126_s27 = scalar_lea.hbm %s1484_s0, 1024 }
  0x28   :  { %p1127_p2 = scmp.ne.s32.totalorder %s1484_s0, %s1126_s27  ;;  %p1130_p3 = scmp.lt.u32.totalorder %s1126_s27, %s1484_s0 }
  0x2a   :  { %p1132_p4 = pnand %p1130_p3, %p1127_p2 }
  0x2c   :  { %1135 = shalt.err (!%p1132_p4)
}
  0x2d   :  { %s1136_s4 = scalar_lea.vmem %s26_s20, 1024  ;;  %p1141_p6 = scmp.lt.s32.totalorder %s26_s20, %s26_s20 }
  0x2e   :  { %p1137_p5 = scmp.ne.s32.totalorder %s26_s20, %s1136_s4  ;;  %p1142_p7 = scmp.lt.s32.totalorder %s1136_s4, %s1136_s4 }
  0x30   :  { %p1143_p8 = por %p1142_p7, %p1141_p6 }
  0x32   :  { %p1144_p9 = pnand %p1143_p8, %p1137_p5 }
  0x34   :  { %1147 = shalt.err (!%p1144_p9)
}
  0x35   :  { %31 = dma.hbm_to_vmem [thread:$0]  %s1484_s0, 1024, %s26_s20, [#allocation3], %s1248_s25, %s1248_s25, %s1249_s26  }
  0x36   :  { %s1148_s17 = scalar_lea.hbm %s1486_s2, 4096 }
  0x37   :  { %p1149_p10 = scmp.ne.s32.totalorder %s1486_s2, %s1148_s17  ;;  %p1152_p11 = scmp.lt.u32.totalorder %s1148_s17, %s1486_s2 }
  0x39   :  { %p1154_p12 = pnand %p1152_p11, %p1149_p10 }
  0x3b   :  { %1157 = shalt.err (!%p1154_p12)
}
  0x3c   :  { %s1158_s21 = scalar_lea.vmem %s1350_s22, 4096  ;;  %p1163_p0 = scmp.lt.s32.totalorder %s1350_s22, %s1350_s22 }
  0x3d   :  { %p1159_p13 = scmp.ne.s32.totalorder %s1350_s22, %s1158_s21  ;;  %p1164_p1 = scmp.lt.s32.totalorder %s1158_s21, %s1158_s21 }
  0x3f   :  { %p1165_p2 = por %p1164_p1, %p1163_p0 }
  0x41   :  { %p1166_p3 = pnand %p1165_p2, %p1159_p13 }
  0x43   :  { %1169 = shalt.err (!%p1166_p3)
}
  0x44   :  { %55 = dma.hbm_to_vmem [thread:$0]  %s1486_s2, 4096, %s1350_s22, [#allocation6], %s1248_s25, %s1248_s25, %s1249_s26  }
  0x45   :  { %s1252_s23 = smov [#allocation10]   ;;  %s1253_s27 = smov [#allocation11]  }
  0x46   :  { %s75_s24 = sshll.u32 %s1252_s23, 4  ;;  %s91_s28 = sshll.u32 %s1253_s27, 4  ;;  %s76_s24 = int_to_ptr.vmem [resolvable:$true] %s75_s24  ;;  %s1387_s28 = int_to_ptr.vmem [resolvable:$true] %s91_s28 }
  0x47   :  { %s1170_s11 = scalar_lea.hbm %s1489_s5, 4096 }
  0x48   :  { %p1171_p4 = scmp.ne.s32.totalorder %s1489_s5, %s1170_s11  ;;  %p1174_p5 = scmp.lt.u32.totalorder %s1170_s11, %s1489_s5 }
  0x4a   :  { %p1176_p6 = pnand %p1174_p5, %p1171_p4 }
  0x4c   :  { %1179 = shalt.err (!%p1176_p6)
}
  0x4d   :  { %s1180_s2 = scalar_lea.vmem %s76_s24, 4096  ;;  %p1185_p8 = scmp.lt.s32.totalorder %s76_s24, %s76_s24 }
  0x4e   :  { %p1181_p7 = scmp.ne.s32.totalorder %s76_s24, %s1180_s2  ;;  %p1186_p9 = scmp.lt.s32.totalorder %s1180_s2, %s1180_s2 }
  0x50   :  { %p1187_p10 = por %p1186_p9, %p1185_p8 }
  0x52   :  { %p1188_p11 = pnand %p1187_p10, %p1181_p7 }
  0x54   :  { %1191 = shalt.err (!%p1188_p11)
}
  0x55   :  { %81 = dma.hbm_to_vmem [thread:$0]  %s1489_s5, 4096, %s76_s24, [#allocation9], %s1248_s25, %s1248_s25, %s1249_s26  }
  0x56   :  { %s1192_s1 = scalar_lea.hbm %s1492_s8, 4096 }
  0x57   :  { %p1193_p12 = scmp.ne.s32.totalorder %s1492_s8, %s1192_s1  ;;  %p1196_p13 = scmp.lt.u32.totalorder %s1192_s1, %s1492_s8 }
  0x59   :  { %p1198_p0 = pnand %p1196_p13, %p1193_p12 }
  0x5b   :  { %1201 = shalt.err (!%p1198_p0)
}
  0x5c   :  { %s1202_s20 = scalar_lea.vmem %s1387_s28, 4096  ;;  %p1207_p2 = scmp.lt.s32.totalorder %s1387_s28, %s1387_s28 }
  0x5d   :  { %p1203_p1 = scmp.ne.s32.totalorder %s1387_s28, %s1202_s20  ;;  %p1208_p3 = scmp.lt.s32.totalorder %s1202_s20, %s1202_s20 }
  0x5f   :  { %p1209_p4 = por %p1208_p3, %p1207_p2 }
  0x61   :  { %p1210_p5 = pnand %p1209_p4, %p1203_p1 }
  0x63   :  { %1213 = shalt.err (!%p1210_p5)
}
  0x64   :  { %97 = dma.hbm_to_vmem [thread:$0]  %s1492_s8, 4096, %s1387_s28, [#allocation12], %s1248_s25, %s1248_s25, %s1249_s26  }
  0x65   :  { %1236 = dma.done.wait [#allocation3], 1024  }
  0x66   :  { %1237 = vsyncadd [#allocation3], 4294966272 }
  0x67   :  { %1238 = dma.done.wait [#allocation6], 4608  }
  0x68   :  { %1239 = vsyncadd [#allocation6], 4294962688 }
  0x69   :  { %1240 = dma.done.wait [#allocation9], 4352  }
  0x6a   :  { %1241 = vsyncadd [#allocation9], 4294962944 }
  0x6b   :  { %1242 = dma.done.wait [#allocation12], 4096  }
  0x6c   :  { %1243 = vsyncadd [#allocation12], 4294963200  ;;  %v1424_v0 = vld [vmem:[#allocation2] sm:$0xff]  ;;  %v1426_v1 = vld [vmem:[#allocation2 + $0x8] sm:$0xff]  ;;  %vm130_vm0 = vcmask 523264   ;;  %vm358_vm1 = vcmask 261120  }
  0x6d   :  { %v1428_v2 = vld [vmem:[#allocation2 + $0x10] sm:$0xff]  ;;  %v947_v3 = vpack.c.bf16 %v1426_v1, %v1424_v0  ;;  %v1432_v4 = vld [vmem:[#allocation2 + $0x18] sm:$0xff]  ;;  %v122_v6 = vld [vmem:[#allocation2 + $0x20] sm:$0xff]  ;;  %vm1255_vm2 = vmmov 0   ;;  %vm557_vm3 = vcmask 130048   ;;  %s1257_s29 = smov [#allocation13]  }
  0x6e   :  { %v951_v5 = vpack.c.bf16 %v1432_v4, %v1428_v2  ;;  %v123_v7 = vld [vmem:[#allocation2 + $0x28] sm:$0xff]  ;;  %v126_v8 = vld [vmem:[#allocation5] sm:$0xff]  ;;  %v124_v9 = vld [vmem:[#allocation2 + $0x30] sm:$0xff]  ;;  %s747_s30 = sshll.u32 %s1257_s29, 4  ;;  %s748_s30 = int_to_ptr.vmem [resolvable:$true] %s747_s30 }
  0x6f   :  { %948 = vmatprep.subr.bf16.mxu0 %v947_v3  ;;  %923 = vmatprep.mubr.msk.f32.mxu0 %vm130_vm0, %v126_v8  ;;  %v125_v10 = vld [vmem:[#allocation2 + $0x38] sm:$0xff]  ;;  %v244_v11 = vld [vmem:[#allocation7 + $0x80] sm:$0xff]  ;;  %v245_v12 = vld [vmem:[#allocation7 + $0x88] sm:$0xff]  ;;  %v955_v14 = vpack.c.bf16 %v123_v7, %v122_v6  ;;  %s1214_s11 = scalar_lea.vmem %s748_s30, 128  ;;  %p1219_p7 = scmp.lt.s32.totalorder %s748_s30, %s748_s30 }
  0x70   :  { %950 = vmatpush3.bf16.msra.mxu0 %v947_v3  ;;  %v228_v13 = vld [vmem:[#allocation7] sm:$0xff]  ;;  %v963_v15 = vpack.c.bf16 %v245_v12, %v244_v11  ;;  %v229_v16 = vld [vmem:[#allocation7 + $0x8] sm:$0xff]  ;;  %v246_v17 = vld [vmem:[#allocation7 + $0x90] sm:$0xff]  ;;  %v959_v26 = vpack.c.bf16 %v125_v10, %v124_v9  ;;  %p1215_p6 = scmp.ne.s32.totalorder %s748_s30, %s1214_s11  ;;  %p1220_p8 = scmp.lt.s32.totalorder %s1214_s11, %s1214_s11 }
  0x71   :  { %952 = vmatprep.subr.bf16.mxu0 %v951_v5  ;;  %v247_v18 = vld [vmem:[#allocation7 + $0x98] sm:$0xff]  ;;  %v965_v19 = vpack.c.bf16 %v229_v16, %v228_v13  ;;  %v230_v21 = vld [vmem:[#allocation7 + $0x10] sm:$0xff]  ;;  %v248_v23 = vld [vmem:[#allocation7 + $0xa0] sm:$0xff] }
  0x72   :  { %v967_v20 = vpack.c.bf16 %v247_v18, %v246_v17  ;;  %v231_v22 = vld [vmem:[#allocation7 + $0x18] sm:$0xff]  ;;  %964 = vmatprep.subr.bf16.mxu1 %v963_v15  ;;  %v249_v24 = vld [vmem:[#allocation7 + $0xa8] sm:$0xff]  ;;  %v232_v28 = vld [vmem:[#allocation7 + $0x20] sm:$0xff]  ;;  %p1221_p9 = por %p1220_p8, %p1219_p7 }
  0x73   :  { %966 = vmatpush3.bf16.msra.mxu1 %v965_v19  ;;  %v969_v25 = vpack.c.bf16 %v231_v22, %v230_v21  ;;  %v971_v27 = vpack.c.bf16 %v249_v24, %v248_v23  ;;  %v233_v29 = vld [vmem:[#allocation7 + $0x28] sm:$0xff]  ;;  %v250_v30 = vld [vmem:[#allocation7 + $0xb0] sm:$0xff]  ;;  %v251_v31 = vld [vmem:[#allocation7 + $0xb8] sm:$0xff] }
  0x74   :  { %954 = vmatpush3.bf16.msra.mxu0 %v951_v5  ;;  %968 = vmatprep.subr.bf16.mxu1 %v967_v20  ;;  %v973_v32 = vpack.c.bf16 %v233_v29, %v232_v28  ;;  %v975_v33 = vpack.c.bf16 %v251_v31, %v250_v30  ;;  %v234_v34 = vld [vmem:[#allocation7 + $0x30] sm:$0xff]  ;;  %v235_v35 = vld [vmem:[#allocation7 + $0x38] sm:$0xff]  ;;  %v252_v36 = vld [vmem:[#allocation7 + $0xc0] sm:$0xff]  ;;  %p1222_p10 = pnand %p1221_p9, %p1215_p6 }
  0x75   :  { %956 = vmatprep.subr.bf16.mxu0 %v955_v14  ;;  %v253_v37 = vld [vmem:[#allocation7 + $0xc8] sm:$0xff]  ;;  %v977_v39 = vpack.c.bf16 %v235_v35, %v234_v34  ;;  %v128_v40 = vld [vmem:[#allocation5 + $0x10] sm:$0xff]  ;;  %v236_v42 = vld [vmem:[#allocation7 + $0x40] sm:$0xff] }
  0x76   :  { %v127_v38 = vld [vmem:[#allocation5 + $0x8] sm:$0xff]  ;;  %v979_v41 = vpack.c.bf16 %v253_v37, %v252_v36  ;;  %v254_v44 = vld [vmem:[#allocation7 + $0xd0] sm:$0xff]  ;;  %v255_v45 = vld [vmem:[#allocation7 + $0xd8] sm:$0xff] }
  0x77   :  { %970 = vmatpush3.bf16.msra.mxu1 %v969_v25  ;;  %v237_v43 = vld [vmem:[#allocation7 + $0x48] sm:$0xff]  ;;  %v129_v46 = vld [vmem:[#allocation5 + $0x18] sm:$0xff]  ;;  %v983_v48 = vpack.c.bf16 %v255_v45, %v254_v44  ;;  %v238_v49 = vld [vmem:[#allocation7 + $0x50] sm:$0xff] }
  0x78   :  { %958 = vmatpush3.bf16.msra.mxu0 %v955_v14  ;;  %972 = vmatprep.subr.bf16.mxu1 %v971_v27  ;;  %v981_v47 = vpack.c.bf16 %v237_v43, %v236_v42  ;;  %v239_v50 = vld [vmem:[#allocation7 + $0x58] sm:$0xff]  ;;  %v256_v51 = vld [vmem:[#allocation7 + $0xe0] sm:$0xff]  ;;  %v257_v52 = vld [vmem:[#allocation7 + $0xe8] sm:$0xff] }
  0x79   :  { %960 = vmatprep.subr.bf16.mxu0 %v959_v26  ;;  %v985_v53 = vpack.c.bf16 %v239_v50, %v238_v49  ;;  %v987_v54 = vpack.c.bf16 %v257_v52, %v256_v51  ;;  %v240_v55 = vld [vmem:[#allocation7 + $0x60] sm:$0xff]  ;;  %v241_v56 = vld [vmem:[#allocation7 + $0x68] sm:$0xff]  ;;  %v258_v57 = vld [vmem:[#allocation7 + $0xf0] sm:$0xff] }
  0x7a   :  { %v259_v58 = vld [vmem:[#allocation7 + $0xf8] sm:$0xff]  ;;  %v989_v59 = vpack.c.bf16 %v241_v56, %v240_v55  ;;  %v242_v61 = vld [vmem:[#allocation7 + $0x70] sm:$0xff]  ;;  %v356_v8 = vld [vmem:[#allocation8] sm:$0xff] }
  0x7b   :  { %974 = vmatpush3.bf16.msra.mxu1 %v973_v32  ;;  %v991_v60 = vpack.c.bf16 %v259_v58, %v258_v57  ;;  %v243_v62 = vld [vmem:[#allocation7 + $0x78] sm:$0xff]  ;;  %v456_v25 = vld [vmem:[#allocation10 + $0x80] sm:$0xff]  ;;  %v459_v34 = vld [vmem:[#allocation10 + $0x98] sm:$0xff] }
  0x7c   :  { %962 = vmatpush3.bf16.msra.mxu0 %v959_v26  ;;  %976 = vmatprep.subr.bf16.mxu1 %v975_v33  ;;  %v993_v63 = vpack.c.bf16 %v243_v62, %v242_v61  ;;  %v457_v26 = vld [vmem:[#allocation10 + $0x88] sm:$0xff]  ;;  %v440_v31 = vld [vmem:[#allocation10] sm:$0xff]  ;;  %v458_v33 = vld [vmem:[#allocation10 + $0x90] sm:$0xff] }
  0x7d   :  { %v1003_v30 = vpack.c.bf16 %v457_v26, %v456_v25  ;;  %v441_v32 = vld [vmem:[#allocation10 + $0x8] sm:$0xff]  ;;  %v357_v35 = vld [vmem:[#allocation8 + $0x8] sm:$0xff]  ;;  %v1007_v37 = vpack.c.bf16 %v459_v34, %v458_v33  ;;  %v444_v44 = vld [vmem:[#allocation10 + $0x20] sm:$0xff] }
  0x7e   :  { %v1005_v36 = vpack.c.bf16 %v441_v32, %v440_v31  ;;  %v445_v45 = vld [vmem:[#allocation10 + $0x28] sm:$0xff]  ;;  %v446_v50 = vld [vmem:[#allocation10 + $0x30] sm:$0xff]  ;;  %v447_v51 = vld [vmem:[#allocation10 + $0x38] sm:$0xff] }
  0x7f   :  { %924 = vmatmul.mubr.msk.f32.vlgmr.msra.gmra.mrb[0].mxu0 %vm130_vm0, %v127_v38  ;;  %978 = vmatpush3.bf16.msra.mxu1 %v977_v39  ;;  %v442_v38 = vld [vmem:[#allocation10 + $0x10] sm:$0xff]  ;;  %v443_v39 = vld [vmem:[#allocation10 + $0x18] sm:$0xff]  ;;  %v464_v52 = vld [vmem:[#allocation10 + $0xc0] sm:$0xff] }
  0x80   :  { %926 = vmatprep.mubr.msk.f32.mxu0 %vm130_vm0, %v128_v40  ;;  %980 = vmatprep.subr.bf16.mxu1 %v979_v41  ;;  %v460_v40 = vld [vmem:[#allocation10 + $0xa0] sm:$0xff]  ;;  %v461_v41 = vld [vmem:[#allocation10 + $0xa8] sm:$0xff]  ;;  %v1009_v42 = vpack.c.bf16 %v443_v39, %v442_v38  ;;  %v466_v58 = vld [vmem:[#allocation10 + $0xd0] sm:$0xff] }
  0x81   :  { %v1011_v43 = vpack.c.bf16 %v461_v41, %v460_v40  ;;  %v448_v56 = vld [vmem:[#allocation10 + $0x40] sm:$0xff]  ;;  %v449_v57 = vld [vmem:[#allocation10 + $0x48] sm:$0xff]  ;;  %v450_v62 = vld [vmem:[#allocation10 + $0x50] sm:$0xff] }
  0x82   :  { %v632_v25 = vld [vmem:[#allocation11 + $0x8] sm:$0xff]  ;;  %v649_v26 = vld [vmem:[#allocation11 + $0x90] sm:$0xff]  ;;  %v635_v32 = vld [vmem:[#allocation11 + $0x20] sm:$0xff] }
  0x83   :  { %927 = vmatmul.mubr.msk.f32.gmra.mrb[2].mxu0 %vm130_vm0, %v129_v46  ;;  %982 = vmatpush3.bf16.msra.mxu1 %v981_v47  ;;  %v462_v46 = vld [vmem:[#allocation10 + $0xb0] sm:$0xff]  ;;  %v463_v47 = vld [vmem:[#allocation10 + $0xb8] sm:$0xff]  ;;  %v636_v33 = vld [vmem:[#allocation11 + $0x28] sm:$0xff] }
  0x84   :  { %984 = vmatprep.subr.bf16.mxu1 %v983_v48  ;;  %937 = vmatprep.mubr.msk.f32.mxu0 %vm358_vm1, %v356_v8  ;;  %v1013_v48 = vpack.c.bf16 %v445_v45, %v444_v44  ;;  %v1015_v49 = vpack.c.bf16 %v463_v47, %v462_v46  ;;  %v452_v8 = vld [vmem:[#allocation10 + $0x60] sm:$0xff]  ;;  %v653_v34 = vld [vmem:[#allocation11 + $0xb0] sm:$0xff]  ;;  %v638_v39 = vld [vmem:[#allocation11 + $0x38] sm:$0xff] }
  0x85   :  { %v637_v38 = vld [vmem:[#allocation11 + $0x30] sm:$0xff]  ;;  %v655_v40 = vld [vmem:[#allocation11 + $0xc0] sm:$0xff]  ;;  %v656_v41 = vld [vmem:[#allocation11 + $0xc8] sm:$0xff] }
  0x86   :  { %v639_v44 = vld [vmem:[#allocation11 + $0x40] sm:$0xff]  ;;  %v640_v45 = vld [vmem:[#allocation11 + $0x48] sm:$0xff]  ;;  %v657_v46 = vld [vmem:[#allocation11 + $0xd0] sm:$0xff] }
  0x87   :  { %986 = vmatpush3.bf16.msra.mxu1 %v985_v53  ;;  %v465_v53 = vld [vmem:[#allocation10 + $0xc8] sm:$0xff]  ;;  %v658_v47 = vld [vmem:[#allocation11 + $0xd8] sm:$0xff] }
  0x88   :  { %988 = vmatprep.subr.bf16.mxu1 %v987_v54  ;;  %v1017_v54 = vpack.c.bf16 %v447_v51, %v446_v50  ;;  %v1019_v55 = vpack.c.bf16 %v465_v53, %v464_v52  ;;  %v641_v50 = vld [vmem:[#allocation11 + $0x50] sm:$0xff]  ;;  %v642_v51 = vld [vmem:[#allocation11 + $0x58] sm:$0xff]  ;;  %v659_v52 = vld [vmem:[#allocation11 + $0xe0] sm:$0xff] }
  0x89   :  { %v660_v53 = vld [vmem:[#allocation11 + $0xe8] sm:$0xff] }
  0x8b   :  { %990 = vmatpush3.bf16.msra.mxu1 %v989_v59  ;;  %v467_v59 = vld [vmem:[#allocation10 + $0xd8] sm:$0xff] }
  0x8c   :  { %992 = vmatprep.subr.bf16.mxu1 %v991_v60  ;;  %v1021_v60 = vpack.c.bf16 %v449_v57, %v448_v56  ;;  %v1023_v61 = vpack.c.bf16 %v467_v59, %v466_v58  ;;  %v643_v56 = vld [vmem:[#allocation11 + $0x60] sm:$0xff]  ;;  %v644_v57 = vld [vmem:[#allocation11 + $0x68] sm:$0xff]  ;;  %v661_v58 = vld [vmem:[#allocation11 + $0xf0] sm:$0xff] }
  0x8d   :  { %v662_v59 = vld [vmem:[#allocation11 + $0xf8] sm:$0xff] }
  0x8f   :  { %994 = vmatpush3.bf16.msra.mxu1 %v993_v63  ;;  %v451_v63 = vld [vmem:[#allocation10 + $0x58] sm:$0xff] }
 0x152   :  { %v925_v3 = vpop.f32.mrb[0].mxu0 }
 0x153   :  { %v209_v5 = vpop.f32.mrb[1].mxu0 }
 0x154   :  { %331 = vmatprep.mubr.f32.mxu1 %v209_v5  ;;  %v469_v5 = vld [vmem:[#allocation10 + $0xe8] sm:$0xff] }
 0x155   :  { %332 = vmatmul.mubr.f32.vlgmr.msra.gmra.mrb[0].mxu1 %v1424_v0  ;;  %v763_v0 = vld [vmem:[%s1487_s3] ss:$0 sm:$0xff] }
 0x156   :  { %336 = vmatprep.mubr.f32.mxu1 %v925_v3  ;;  %v928_v6 = vpop.f32.mrb[2].mxu0  ;;  %v468_v3 = vld [vmem:[#allocation10 + $0xe0] sm:$0xff] }
 0x157   :  { %v219_v7 = vpop.f32.mrb[3].mxu0 }
 0x159   :  { %337 = vmatmul.mubr.f32.gmra.mrb[2].mxu1 %v1426_v1 }
 0x15a   :  { %341 = vmatprep.mubr.f32.mxu1 %v219_v7  ;;  %v1027_v7 = vpack.c.bf16 %v469_v5, %v468_v3 }
 0x15d   :  { %342 = vmatmul.mubr.f32.gmra.mrb[4].mxu1 %v1428_v2 }
 0x15e   :  { %346 = vmatprep.mubr.f32.mxu1 %v928_v6  ;;  %v1025_v6 = vpack.c.bf16 %v451_v63, %v450_v62  ;;  %v645_v62 = vld [vmem:[#allocation11 + $0x70] sm:$0xff]  ;;  %v646_v63 = vld [vmem:[#allocation11 + $0x78] sm:$0xff] }
 0x15f   :  { %v1068_v3 = vpack.c.bf16 %v646_v63, %v645_v62 }
 0x161   :  { %347 = vmatmul.mubr.f32.gmra.mrb[6].mxu1 %v1432_v4 }
 0x228   :  { %v813_v9 = vpop.f32.mrb[0].mxu1 }
 0x229   :  { %v814_v10 = vpop.f32.mrb[1].mxu1 }
 0x22a   :  { %v815_v11 = vadd.f32 %v814_v10, %v813_v9  ;;  %v453_v9 = vld [vmem:[#allocation10 + $0x68] sm:$0xff]  ;;  %v470_v10 = vld [vmem:[#allocation10 + $0xf0] sm:$0xff] }
 0x22c   :  { %v816_v12 = vpop.f32.mrb[2].mxu1  ;;  %v1448_v1 = vadd.f32 %v815_v11, %v763_v0  ;;  %v471_v11 = vld [vmem:[#allocation10 + $0xf8] sm:$0xff] }
 0x22d   :  { %v817_v13 = vpop.f32.mrb[3].mxu1 }
 0x22e   :  { %v818_v14 = vadd.f32 %v817_v13, %v816_v12  ;;  %v352_v16 = vmax.f32 %v1448_v1, 0.0  ;;  %v1031_v12 = vpack.c.bf16 %v471_v11, %v470_v10  ;;  %v454_v13 = vld [vmem:[#allocation10 + $0x70] sm:$0xff] }
 0x22f   :  { %v633_v1 = vld [vmem:[#allocation11 + $0x10] sm:$0xff] }
 0x230   :  { %v1450_v2 = vadd.f32 %v818_v14, %v763_v0  ;;  %v819_v15 = vpop.f32.mrb[4].mxu1  ;;  %v455_v14 = vld [vmem:[#allocation10 + $0x78] sm:$0xff] }
 0x231   :  { %v820_v4 = vpop.f32.mrb[5].mxu1 }
 0x232   :  { %v353_v17 = vmax.f32 %v1450_v2, 0.0  ;;  %v821_v18 = vadd.f32 %v820_v4, %v819_v15  ;;  %v1033_v15 = vpack.c.bf16 %v455_v14, %v454_v13  ;;  %v652_v2 = vld [vmem:[#allocation11 + $0xa8] sm:$0xff] }
 0x234   :  { %v822_v19 = vpop.f32.mrb[6].mxu1  ;;  %v995_v20 = vpack.c.bf16 %v353_v17, %v352_v16  ;;  %v344_v22 = vadd.f32 %v821_v18, %v763_v0 }
 0x235   :  { %v823_v21 = vpop.f32.mrb[7].mxu1 }
 0x236   :  { %v824_v23 = vadd.f32 %v823_v21, %v822_v19  ;;  %996 = vmatprep.subr.bf16.mxu0 %v995_v20  ;;  %v354_v27 = vmax.f32 %v344_v22, 0.0  ;;  %v1254_v19 = vmov 0.0|0.0   ;;  %v647_v21 = vld [vmem:[#allocation11 + $0x80] sm:$0xff]  ;;  %v648_v22 = vld [vmem:[#allocation11 + $0x88] sm:$0xff] }
 0x237   :  { %998 = vmatpush3.bf16.msra.mxu0 %v995_v20  ;;  %v1256_v20 = vmov 0.0  }
 0x238   :  { %v349_v24 = vadd.f32 %v824_v23, %v763_v0  ;;  %v1029_v0 = vpack.c.bf16 %v453_v9, %v452_v8  ;;  %v631_v23 = vld [vmem:[#allocation11] sm:$0xff]  ;;  %v766_v8 = vld [vmem:[%s1490_s6] ss:$0 sm:$0xff] }
 0x23a   :  { %v355_v28 = vmax.f32 %v349_v24, 0.0  ;;  %v1038_v24 = vpack.c.bf16 %v648_v22, %v647_v21  ;;  %v768_v21 = vld [vmem:[%s1493_s9] ss:$0 sm:$0xff] }
 0x23c   :  { %v999_v29 = vpack.c.bf16 %v355_v28, %v354_v27  ;;  %v650_v27 = vld [vmem:[#allocation11 + $0x98] sm:$0xff]  ;;  %v1040_v28 = vpack.c.bf16 %v632_v25, %v631_v23  ;;  %1039 = vmatprep.subr.bf16.mxu1 %v1038_v24 }
 0x23e   :  { %1000 = vmatprep.subr.bf16.mxu0 %v999_v29  ;;  %1041 = vmatpush3.bf16.msra.mxu1 %v1040_v28 }
 0x23f   :  { %1002 = vmatpush3.bf16.msra.mxu0 %v999_v29  ;;  %v1042_v29 = vpack.c.bf16 %v650_v27, %v649_v26 }
 0x240   :  { %1004 = vmatprep.subr.bf16.mxu0 %v1003_v30  ;;  %v651_v30 = vld [vmem:[#allocation11 + $0xa0] sm:$0xff] }
 0x241   :  { %1043 = vmatprep.subr.bf16.mxu1 %v1042_v29  ;;  %v1046_v31 = vpack.c.bf16 %v652_v2, %v651_v30 }
 0x242   :  { %938 = vmatmul.mubr.msk.f32.vlgmr.msra.gmra.mrb[4].mxu0 %vm358_vm1, %v357_v35  ;;  %v654_v35 = vld [vmem:[#allocation11 + $0xb8] sm:$0xff] }
 0x243   :  { %1006 = vmatpush3.bf16.msra.mxu0 %v1005_v36  ;;  %v1048_v36 = vpack.c.bf16 %v636_v33, %v635_v32 }
 0x244   :  { %1008 = vmatprep.subr.bf16.mxu0 %v1007_v37  ;;  %v1050_v37 = vpack.c.bf16 %v654_v35, %v653_v34 }
 0x247   :  { %1010 = vmatpush3.bf16.msra.mxu0 %v1009_v42  ;;  %v1052_v42 = vpack.c.bf16 %v638_v39, %v637_v38 }
 0x248   :  { %1012 = vmatprep.subr.bf16.mxu0 %v1011_v43  ;;  %v1054_v43 = vpack.c.bf16 %v656_v41, %v655_v40 }
 0x24b   :  { %1014 = vmatpush3.bf16.msra.mxu0 %v1013_v48  ;;  %v1056_v48 = vpack.c.bf16 %v640_v45, %v639_v44 }
 0x24c   :  { %1016 = vmatprep.subr.bf16.mxu0 %v1015_v49  ;;  %v1058_v49 = vpack.c.bf16 %v658_v47, %v657_v46 }
 0x24f   :  { %1018 = vmatpush3.bf16.msra.mxu0 %v1017_v54  ;;  %v1060_v54 = vpack.c.bf16 %v642_v51, %v641_v50 }
 0x250   :  { %1020 = vmatprep.subr.bf16.mxu0 %v1019_v55  ;;  %v1062_v55 = vpack.c.bf16 %v660_v53, %v659_v52 }
 0x253   :  { %1022 = vmatpush3.bf16.msra.mxu0 %v1021_v60  ;;  %v1064_v60 = vpack.c.bf16 %v644_v57, %v643_v56 }
 0x254   :  { %1024 = vmatprep.subr.bf16.mxu0 %v1023_v61  ;;  %v1066_v61 = vpack.c.bf16 %v662_v59, %v661_v58 }
 0x257   :  { %1026 = vmatpush3.bf16.msra.mxu0 %v1025_v6 }
 0x258   :  { %1028 = vmatprep.subr.bf16.mxu0 %v1027_v7 }
 0x25b   :  { %1030 = vmatpush3.bf16.msra.mxu0 %v1029_v0 }
 0x25c   :  { %1032 = vmatprep.subr.bf16.mxu0 %v1031_v12 }
 0x25f   :  { %1034 = vmatpush3.bf16.msra.mxu0 %v1033_v15 }
 0x260   :  { %1035 = vmatprep.subr.bf16.mxu0 %v1254_v19 }
 0x315   :  { %v939_v4 = vpop.f32.mrb[4].mxu0 }
 0x316   :  { %v431_v18 = vpop.f32.mrb[5].mxu0 }
 0x317   :  { %543 = vmatprep.mubr.f32.mxu0 %v431_v18 }
 0x318   :  { %544 = vmatmul.mubr.f32.vlgmr.msra.gmra.mrb[6].mxu0 %v352_v16  ;;  %v634_v16 = vld [vmem:[#allocation11 + $0x18] sm:$0xff] }
 0x319   :  { %548 = vmatprep.mubr.f32.mxu0 %v939_v4  ;;  %v556_v4 = vld [vmem:[%s1491_s7] sm:$0xff] }
 0x31c   :  { %549 = vmatmul.mubr.f32.gmra.mrb[8].mxu0 %v353_v17  ;;  %v1044_v17 = vpack.c.bf16 %v634_v16, %v633_v1 }
 0x31d   :  { %944 = vmatprep.mubr.msk.f32.mxu0 %vm1255_vm2, %v1256_v20 }
 0x31e   :  { %1045 = vmatpush3.bf16.msra.mxu1 %v1044_v17 }
 0x31f   :  { %1047 = vmatprep.subr.bf16.mxu1 %v1046_v31 }
 0x322   :  { %1049 = vmatpush3.bf16.msra.mxu1 %v1048_v36 }
 0x323   :  { %1051 = vmatprep.subr.bf16.mxu1 %v1050_v37 }
 0x326   :  { %1053 = vmatpush3.bf16.msra.mxu1 %v1052_v42 }
 0x327   :  { %1055 = vmatprep.subr.bf16.mxu1 %v1054_v43 }
 0x32a   :  { %1057 = vmatpush3.bf16.msra.mxu1 %v1056_v48 }
 0x32b   :  { %1059 = vmatprep.subr.bf16.mxu1 %v1058_v49 }
 0x32e   :  { %1061 = vmatpush3.bf16.msra.mxu1 %v1060_v54 }
 0x32f   :  { %1063 = vmatprep.subr.bf16.mxu1 %v1062_v55 }
 0x332   :  { %1065 = vmatpush3.bf16.msra.mxu1 %v1064_v60 }
 0x333   :  { %1067 = vmatprep.subr.bf16.mxu1 %v1066_v61 }
 0x336   :  { %1069 = vmatpush3.bf16.msra.mxu1 %v1068_v3 }
 0x3eb   :  { %v863_v5 = vpop.f32.mrb[6].mxu0 }
 0x3ec   :  { %v864_v6 = vpop.f32.mrb[7].mxu0 }
 0x3ed   :  { %v865_v7 = vadd.f32 %v864_v6, %v863_v5 }
 0x3ef   :  { %v866_v9 = vpop.f32.mrb[8].mxu0  ;;  %v546_v11 = vadd.f32 %v865_v7, %v766_v8 }
 0x3f0   :  { %v867_v10 = vpop.f32.mrb[9].mxu0 }
 0x3f1   :  { %v868_v0 = vadd.f32 %v867_v10, %v866_v9  ;;  %v554_v13 = vmax.f32 %v546_v11, 0.0 }
 0x3f3   :  { %v551_v12 = vadd.f32 %v868_v0, %v766_v8 }
 0x3f5   :  { %v555_v14 = vmax.f32 %v551_v12, 0.0 }
 0x3f7   :  { %v1036_v15 = vpack.c.bf16 %v555_v14, %v554_v13 }
 0x3f9   :  { %1037 = vmatpush3.bf16.msra.mxu0 %v1036_v15 }
 0x3fc   :  { %945 = vmatmul.mubr.msk.f32.vlgmr.msra.gmra.mrb[10].mxu0 %vm557_vm3, %v556_v4 }
 0x4cf   :  { %v627_v18 = vpop.f32.mrb[10].mxu0 }
 0x4d0   :  { %734 = vmatprep.mubr.f32.mxu1 %v627_v18  ;;  %v946_v19 = vpop.f32.mrb[11].mxu0 }
 0x4d1   :  { %735 = vmatmul.mubr.f32.vlgmr.msra.gmra.mrb[8].mxu1 %v554_v13 }
 0x5a4   :  { %v904_v20 = vpop.f32.mrb[8].mxu1 }
 0x5a5   :  { %v905_v22 = vpop.f32.mrb[9].mxu1 }
 0x5a6   :  { %v906_v23 = vadd.f32 %v905_v22, %v904_v20 }
 0x5a8   :  { %v737_v24 = vadd.f32 %v906_v23, %v768_v21 }
 0x5aa   :  { %740 = vst [vmem:[#allocation13] sm:$0xff] %v737_v24 }
 0x5ab   :  { %1225 = shalt.err (!%p1222_p10)
}
 0x5ac   :  { %s1226_s16 = scalar_lea.hbm %s1494_s10, 128 }
 0x5ad   :  { %p1227_p11 = scmp.ne.s32.totalorder %s1494_s10, %s1226_s16  ;;  %p1230_p12 = scmp.lt.u32.totalorder %s1226_s16, %s1494_s10 }
 0x5af   :  { %p1232_p13 = pnand %p1230_p12, %p1227_p11 }
 0x5b1   :  { %1235 = shalt.err (!%p1232_p13)
}
 0x5b2   :  { %750 = dma.vmem_to_hbm [thread:$0]  %s748_s30, 128, %s1494_s10, [#allocation4]  }
 0x5b3   :  { %1244 = dma.done.wait [#allocation4], 128  }
 0x5b4   :  { %1245 = vsyncadd [#allocation4], 4294967168 }
 0x5b5   :  { %754 = vsyncpa [#allocation3], 1 }
 0x5b6   :  { %755 = vsyncpa [#allocation6], 1 }
 0x5b7   :  { %756 = vsyncpa [#allocation9], 1 }
 0x5b8   :  { %757 = vsyncpa [#allocation12], 1 }
 0x5b9   :  { %758 = vsyncpa [#allocation4], 1 }

</bundles_post_ra>
